<compile_context>
chip_gen: v7x
topology: tpu7x:2x2x1
jax: 0.10.0
libtpu: 0.0.40
codegen_flags: <defaults>
</compile_context>

<pallas_src>
import jax
import jax.numpy as jnp
from jax.experimental import pallas as pl
from jax.experimental.pallas import tpu as pltpu

NEG_SLOPE = 0.01   # nn.LeakyReLU default
BN_EPS = 1e-5      # nn.BatchNorm1d default (training-mode batch statistics)


def _leaky(v):
    return jnp.where(v > 0, v, NEG_SLOPE * v)


# ---------------------------------------------------------------- fused kernel factory
def make_fused_kernel(n_layer, T, B):
    """conv1d('same') -> n_layer stacked LSTM (wavefronted) -> sum_t/len -> concat aux -> head."""

    def kernel(*refs):
        xcol_ref, convw_ref, convb_ref = refs[0:3]
        idx = 3
        wih0_ref, whh0_ref, b0_ref = refs[idx:idx + 3]
        idx += 3
        upper = []                       # layers >= 1: (wcat_ref (2H,4H), b_ref (1,4H))
        for _ in range(1, n_layer):
            upper.append(refs[idx:idx + 2])
            idx += 2
        (l_ref, haux_ref,
         w1_ref, b1_ref, g1_ref, be1_ref,
         w2_ref, b2_ref, w3_ref, b3_ref, w4_ref, b4_ref,
         o_ref) = refs[idx:]

        H = whh0_ref.shape[0]

        # ---- Conv1d (same padding, odd K) as a single im2col matmul; xcol built in the wrapper.
        seq = (jnp.dot(xcol_ref[...], convw_ref[...], preferred_element_type=jnp.float32)
               + convb_ref[...])                                  # (T*B, Cout), rows t-major

        # ---- Layer-0 input projection hoisted off the recurrence (one big matmul);
        #      per-t slices are hoisted before the wave loop (not on the serial chain).
        xproj0 = (jnp.dot(seq, wih0_ref[...], preferred_element_type=jnp.float32)
                  + b0_ref[...])                                  # (T*B, 4H)
        xproj0_t = [xproj0[t * B:(t + 1) * B, :] for t in range(T)]

        whh0 = whh0_ref[...]
        wcat = [None] + [w[...] for (w, _) in upper]              # (2H, 4H) = [W_ih; W_hh]
        bcat = [None] + [b[...] for (_, b) in upper]              # (1, 4H)

        def lstm_cell(gate, c_prev):
            # full-row sigmoid/tanh (2 EUP pushes), then slice; PyTorch gate order i, f, g, o
            sg = jax.nn.sigmoid(gate)
            tg = jnp.tanh(gate)
            i_g = sg[:, 0 * H:1 * H]
            f_g = sg[:, 1 * H:2 * H]
            g_g = tg[:, 2 * H:3 * H]
            o_g = sg[:, 3 * H:4 * H]
            c_new = f_g * c_prev + i_g * g_g
            h_new = o_g * jnp.tanh(c_new)
            return h_new, c_new

        zero = jnp.zeros((B, H), jnp.float32)
        h_state = [zero] * n_layer
        c_state = [zero] * n_layer
        out_prev = [zero] * n_layer      # h emitted by layer li in the previous wave
        acc = zero                       # online sum over t of the last layer's h

        # ---- Wavefront schedule: cell (li, t) runs at wave s = li + t.  Cells within a wave are
        #      independent, so the serial chain is T + n_layer - 1 segments (not n_layer * T).
        for s in range(T + n_layer - 1):
            new_out = list(out_prev)
            for li in range(n_layer):
                t = s - li
                if not (0 <= t < T):
                    continue
                if li == 0:
                    gate = xproj0_t[t] + jnp.dot(
                        h_state[0], whh0, preferred_element_type=jnp.float32)
                else:
                    # fold the input projection into the recurrent matmul:
                    # [h_{li-1,t}, h_{li,t-1}] (B,2H) @ [W_ih; W_hh] (2H,4H) + b
                    lhs = jnp.concatenate([out_prev[li - 1], h_state[li]], axis=1)
                    gate = (jnp.dot(lhs, wcat[li], preferred_element_type=jnp.float32)
                            + bcat[li])
                h_new, c_new = lstm_cell(gate, c_state[li])
                h_state[li] = h_new
                c_state[li] = c_new
                new_out[li] = h_new
                if li == n_layer - 1:
                    acc = acc + h_new
            out_prev = new_out

        # ---- Head: x / mm(l, ones) is a broadcast divide by l; then concat aux h.
        x = acc / l_ref[...]                                      # (B, H)
        x = jnp.concatenate([x, haux_ref[...]], axis=1)           # (B, H+1)

        y = jnp.dot(x, w1_ref[...], preferred_element_type=jnp.float32) + b1_ref[...]
        # BatchNorm1d in training mode (fresh module defaults to .train()): batch stats, biased var
        mean = jnp.mean(y, axis=0, keepdims=True)
        var = jnp.mean((y - mean) ** 2, axis=0, keepdims=True)
        y = g1_ref[...] * (y - mean) * jax.lax.rsqrt(var + BN_EPS) + be1_ref[...]
        y = _leaky(y)
        y = _leaky(jnp.dot(y, w2_ref[...], preferred_element_type=jnp.float32) + b2_ref[...])
        y = _leaky(jnp.dot(y, w3_ref[...], preferred_element_type=jnp.float32) + b3_ref[...])
        o_ref[...] = jnp.dot(y, w4_ref[...], preferred_element_type=jnp.float32) + b4_ref[...]

    return kernel


# ---------------------------------------------------------------- full forward
@jax.jit
def mlpenet_forward(params, x, l, haux):
    # x: (B, T, C_in) batch-first / channel-last (exactly what the PyTorch module receives)
    B, T, Cin = x.shape
    K, _, Cout = params["conv_w"].shape
    if K % 2 == 0:
        raise ValueError("Conv1d 'same' emulation assumes odd kernel_size (padding = K//2).")
    pad = K // 2
    # layout plumbing stays in XLA: pad time axis, go time-major, build im2col columns.
    xp = jnp.transpose(jnp.pad(x, ((0, 0), (pad, pad), (0, 0))), (1, 0, 2))   # (T+K-1, B, Cin)
    xcol = jnp.concatenate([xp[k:k + T].reshape(T * B, Cin) for k in range(K)],
                           axis=1)                                            # (T*B, K*Cin)
    convw = params["conv_w"].reshape(K * Cin, Cout)
    convb = params["conv_b"].reshape(1, Cout)

    lstm_flat = []
    for li, layer in enumerate(params["lstm"]):
        if li == 0:
            lstm_flat += [layer["wih"], layer["whh"], layer["b"].reshape(1, -1)]
        else:
            # layers >= 1 consume [h_below, h_own]; pre-concatenate [W_ih; W_hh] in the wrapper
            lstm_flat += [jnp.concatenate([layer["wih"], layer["whh"]], axis=0),
                          layer["b"].reshape(1, -1)]

    inputs = (xcol, convw, convb, *lstm_flat, l, haux, *params["head"])
    kernel = make_fused_kernel(len(params["lstm"]), T, B)
    return pl.pallas_call(
        kernel,
        out_shape=jax.ShapeDtypeStruct((B, 1), jnp.float32),
        in_specs=[pl.BlockSpec(memory_space=pltpu.MemorySpace.VMEM)] * len(inputs),
        out_specs=pl.BlockSpec(memory_space=pltpu.MemorySpace.VMEM),
    )(*inputs)


# ---------------------------------------------------------------- deterministic params
def init_params(key, in_dim, hidden_dim, n_layer, conv_out=50, ksize=3, nn_size=20):
    keys = jax.random.split(key, 12)
    p = {}
    p["conv_w"] = 0.1 * jax.random.normal(keys[0], (ksize, in_dim, conv_out), jnp.float32)
    p["conv_b"] = 0.01 * jax.random.normal(keys[1], (conv_out,), jnp.float32)
    # TODO(synk): PyTorch uses orthogonal init for LSTM weights; deterministic scaled
    # normal used here (synthetic weights, not a checkpoint).  Loading a real checkpoint
    # requires transposing (4H,D)->(D,4H) while preserving the i,f,g,o gate-block order.
    lstm = []
    d = conv_out
    for i in range(n_layer):
        ki = jax.random.fold_in(keys[2], i)
        k1, k2 = jax.random.split(ki)
        lstm.append(dict(
            wih=jax.random.normal(k1, (d, 4 * hidden_dim), jnp.float32) / jnp.sqrt(d),
            whh=jax.random.normal(k2, (hidden_dim, 4 * hidden_dim), jnp.float32) / jnp.sqrt(hidden_dim),
            b=jnp.zeros((4 * hidden_dim,), jnp.float32),  # init_weights() zeroes LSTM biases
        ))
        d = hidden_dim
    p["lstm"] = lstm

    def lin(kk, fan_in, fan_out):
        return jax.random.normal(kk, (fan_in, fan_out), jnp.float32) / jnp.sqrt(fan_in)

    p["head"] = (
        lin(keys[3], hidden_dim + 1, nn_size),
        0.01 * jax.random.normal(keys[4], (1, nn_size), jnp.float32),
        jnp.ones((1, nn_size), jnp.float32),   # BN gamma
        jnp.zeros((1, nn_size), jnp.float32),  # BN beta
        lin(keys[5], nn_size, nn_size),
        0.01 * jax.random.normal(keys[6], (1, nn_size), jnp.float32),
        lin(keys[7], nn_size, nn_size),
        0.01 * jax.random.normal(keys[8], (1, nn_size), jnp.float32),
        lin(keys[9], nn_size, 1),
        0.01 * jax.random.normal(keys[10], (1, 1), jnp.float32),
    )
    return p


# ---------------------------------------------------------------- pure-JAX reference
def reference_forward(params, x, l, haux):
    B, T, _ = x.shape
    K = params["conv_w"].shape[0]
    pad = K // 2
    xp = jnp.pad(x, ((0, 0), (pad, pad), (0, 0)))
    xc = sum(jnp.einsum("btc,co->bto", xp[:, k:k + T, :], params["conv_w"][k]) for k in range(K))
    seq = xc + params["conv_b"][None, None, :]
    for layer in params["lstm"]:
        H = layer["whh"].shape[0]

        def step(carry, xt):
            h, c = carry
            g = xt @ layer["wih"] + h @ layer["whh"] + layer["b"][None, :]
            i = jax.nn.sigmoid(g[:, :H]); f = jax.nn.sigmoid(g[:, H:2 * H])
            gg = jnp.tanh(g[:, 2 * H:3 * H]); o = jax.nn.sigmoid(g[:, 3 * H:])
            c = f * c + i * gg
            h = o * jnp.tanh(c)
            return (h, c), h

        z = jnp.zeros((B, H), jnp.float32)
        (_, _), hs = jax.lax.scan(step, (z, z), jnp.transpose(seq, (1, 0, 2)))
        seq = jnp.transpose(hs, (1, 0, 2))
    sum_h = jnp.sum(seq, axis=1)
    xh = jnp.concatenate([sum_h / l, haux], axis=1)
    w1, b1, g1, be1, w2, b2, w3, b3, w4, b4 = params["head"]
    y = xh @ w1 + b1
    mean = jnp.mean(y, axis=0, keepdims=True)
    var = jnp.mean((y - mean) ** 2, axis=0, keepdims=True)
    y = g1 * (y - mean) * jax.lax.rsqrt(var + BN_EPS) + be1
    y = _leaky(y)
    y = _leaky(y @ w2 + b2)
    y = _leaky(y @ w3 + b3)
    return y @ w4 + b4


if __name__ == "__main__":
    import numpy as np

    B, T, in_dim, hidden_dim = 2, 8, 4, 32
    key = jax.random.PRNGKey(0)

    # exercise both the single-layer path and the stacked-layer (wavefronted) path
    for n_layer in (1, 2):
        kx, kh, kp = jax.random.split(jax.random.fold_in(key, n_layer), 3)
        x = jax.random.normal(kx, (B, T, in_dim), jnp.float32)      # trajectory data
        l = jnp.full((B, 1), float(T), jnp.float32)                 # trajectory lengths
        haux = jax.random.normal(kh, (B, 1), jnp.float32)           # auxiliary input (time span)

        params = init_params(kp, in_dim, hidden_dim, n_layer)

        out = jax.block_until_ready(mlpenet_forward(params, x, l, haux))
        assert out.shape == (B, 1)

        ref = reference_forward(params, x, l, haux)
        np.testing.assert_allclose(np.asarray(out), np.asarray(ref), rtol=2e-4, atol=2e-4)

    print("KERNEL_OK")
</pallas_src>

<mosaic_0001>
module attributes {stable_mosaic.version = 11 : i64} {
  func.func @kernel(%arg0: memref<16x12xf32, #tpu.memory_space<vmem>>, %arg1: memref<12x50xf32, #tpu.memory_space<vmem>>, %arg2: memref<1x50xf32, #tpu.memory_space<vmem>>, %arg3: memref<50x128xf32, #tpu.memory_space<vmem>>, %arg4: memref<32x128xf32, #tpu.memory_space<vmem>>, %arg5: memref<1x128xf32, #tpu.memory_space<vmem>>, %arg6: memref<2x1xf32, #tpu.memory_space<vmem>>, %arg7: memref<2x1xf32, #tpu.memory_space<vmem>>, %arg8: memref<33x20xf32, #tpu.memory_space<vmem>>, %arg9: memref<1x20xf32, #tpu.memory_space<vmem>>, %arg10: memref<1x20xf32, #tpu.memory_space<vmem>>, %arg11: memref<1x20xf32, #tpu.memory_space<vmem>>, %arg12: memref<20x20xf32, #tpu.memory_space<vmem>>, %arg13: memref<1x20xf32, #tpu.memory_space<vmem>>, %arg14: memref<20x20xf32, #tpu.memory_space<vmem>>, %arg15: memref<1x20xf32, #tpu.memory_space<vmem>>, %arg16: memref<20x1xf32, #tpu.memory_space<vmem>>, %arg17: memref<1x1xf32, #tpu.memory_space<vmem>>, %arg18: memref<2x1xf32, #tpu.memory_space<vmem>>) attributes {dimension_semantics = [], scalar_prefetch = 0 : i64, scratch_operands = 0 : i64, tpu.core_type = #tpu.core_type<tc>} {
    %c0 = arith.constant 0 : index
    %c0_0 = arith.constant 0 : index
    %0 = vector.load %arg0[%c0, %c0_0] : memref<16x12xf32, #tpu.memory_space<vmem>>, vector<16x12xf32>
    %c0_1 = arith.constant 0 : index
    %c0_2 = arith.constant 0 : index
    %1 = vector.load %arg1[%c0_1, %c0_2] : memref<12x50xf32, #tpu.memory_space<vmem>>, vector<12x50xf32>
    %cst = arith.constant dense<0.000000e+00> : vector<16x50xf32>
    %2 = tpu.matmul %0, %1, %cst {dimension_numbers = #tpu.dot_dimension_numbers<[1], [0], [0], [1], [0, 0, 1, 1], [], []>} : vector<16x12xf32>, vector<12x50xf32>, vector<16x50xf32> -> vector<16x50xf32>
    %c0_3 = arith.constant 0 : index
    %c0_4 = arith.constant 0 : index
    %3 = vector.load %arg2[%c0_3, %c0_4] : memref<1x50xf32, #tpu.memory_space<vmem>>, vector<1x50xf32>
    %4 = vector.broadcast %3 : vector<1x50xf32> to vector<16x50xf32>
    %5 = arith.addf %2, %4 : vector<16x50xf32>
    %c0_5 = arith.constant 0 : index
    %c0_6 = arith.constant 0 : index
    %6 = vector.load %arg3[%c0_5, %c0_6] : memref<50x128xf32, #tpu.memory_space<vmem>>, vector<50x128xf32>
    %cst_7 = arith.constant dense<0.000000e+00> : vector<16x128xf32>
    %7 = tpu.matmul %5, %6, %cst_7 {dimension_numbers = #tpu.dot_dimension_numbers<[1], [0], [0], [1], [0, 0, 1, 1], [], []>} : vector<16x50xf32>, vector<50x128xf32>, vector<16x128xf32> -> vector<16x128xf32>
    %c0_8 = arith.constant 0 : index
    %c0_9 = arith.constant 0 : index
    %8 = vector.load %arg5[%c0_8, %c0_9] : memref<1x128xf32, #tpu.memory_space<vmem>>, vector<1x128xf32>
    %9 = vector.broadcast %8 : vector<1x128xf32> to vector<16x128xf32>
    %10 = arith.addf %7, %9 : vector<16x128xf32>
    %11 = vector.extract_strided_slice %10 {offsets = [0, 0], sizes = [2, 128], strides = [1, 1]} : vector<16x128xf32> to vector<2x128xf32>
    %12 = vector.extract_strided_slice %10 {offsets = [2, 0], sizes = [2, 128], strides = [1, 1]} : vector<16x128xf32> to vector<2x128xf32>
    %13 = vector.extract_strided_slice %10 {offsets = [4, 0], sizes = [2, 128], strides = [1, 1]} : vector<16x128xf32> to vector<2x128xf32>
    %14 = vector.extract_strided_slice %10 {offsets = [6, 0], sizes = [2, 128], strides = [1, 1]} : vector<16x128xf32> to vector<2x128xf32>
    %15 = vector.extract_strided_slice %10 {offsets = [8, 0], sizes = [2, 128], strides = [1, 1]} : vector<16x128xf32> to vector<2x128xf32>
    %16 = vector.extract_strided_slice %10 {offsets = [10, 0], sizes = [2, 128], strides = [1, 1]} : vector<16x128xf32> to vector<2x128xf32>
    %17 = vector.extract_strided_slice %10 {offsets = [12, 0], sizes = [2, 128], strides = [1, 1]} : vector<16x128xf32> to vector<2x128xf32>
    %18 = vector.extract_strided_slice %10 {offsets = [14, 0], sizes = [2, 128], strides = [1, 1]} : vector<16x128xf32> to vector<2x128xf32>
    %c0_10 = arith.constant 0 : index
    %c0_11 = arith.constant 0 : index
    %19 = vector.load %arg4[%c0_10, %c0_11] : memref<32x128xf32, #tpu.memory_space<vmem>>, vector<32x128xf32>
    %cst_12 = arith.constant 0.000000e+00 : f32
    %20 = vector.broadcast %cst_12 : f32 to vector<2x32xf32>
    %cst_13 = arith.constant dense<0.000000e+00> : vector<2x128xf32>
    %21 = tpu.matmul %20, %19, %cst_13 {dimension_numbers = #tpu.dot_dimension_numbers<[1], [0], [0], [1], [0, 0, 1, 1], [], []>} : vector<2x32xf32>, vector<32x128xf32>, vector<2x128xf32> -> vector<2x128xf32>
    %22 = arith.addf %11, %21 : vector<2x128xf32>
    %23 = arith.negf %22 : vector<2x128xf32>
    %24 = math.exp %23 : vector<2x128xf32>
    %cst_14 = arith.constant 1.000000e+00 : f32
    %25 = vector.broadcast %cst_14 : f32 to vector<2x128xf32>
    %26 = arith.addf %25, %24 : vector<2x128xf32>
    %27 = arith.divf %25, %26 : vector<2x128xf32>
    %28 = math.tanh %22 : vector<2x128xf32>
    %29 = vector.extract_strided_slice %27 {offsets = [0, 0], sizes = [2, 32], strides = [1, 1]} : vector<2x128xf32> to vector<2x32xf32>
    %30 = vector.extract_strided_slice %27 {offsets = [0, 32], sizes = [2, 32], strides = [1, 1]} : vector<2x128xf32> to vector<2x32xf32>
    %31 = vector.extract_strided_slice %28 {offsets = [0, 64], sizes = [2, 32], strides = [1, 1]} : vector<2x128xf32> to vector<2x32xf32>
    %32 = vector.extract_strided_slice %27 {offsets = [0, 96], sizes = [2, 32], strides = [1, 1]} : vector<2x128xf32> to vector<2x32xf32>
    %33 = arith.mulf %30, %20 : vector<2x32xf32>
    %34 = arith.mulf %29, %31 : vector<2x32xf32>
    %35 = arith.addf %33, %34 : vector<2x32xf32>
    %36 = math.tanh %35 : vector<2x32xf32>
    %37 = arith.mulf %32, %36 : vector<2x32xf32>
    %38 = arith.addf %20, %37 : vector<2x32xf32>
    %cst_15 = arith.constant dense<0.000000e+00> : vector<2x128xf32>
    %39 = tpu.matmul %37, %19, %cst_15 {dimension_numbers = #tpu.dot_dimension_numbers<[1], [0], [0], [1], [0, 0, 1, 1], [], []>} : vector<2x32xf32>, vector<32x128xf32>, vector<2x128xf32> -> vector<2x128xf32>
    %40 = arith.addf %12, %39 : vector<2x128xf32>
    %41 = arith.negf %40 : vector<2x128xf32>
    %42 = math.exp %41 : vector<2x128xf32>
    %cst_16 = arith.constant 1.000000e+00 : f32
    %43 = vector.broadcast %cst_16 : f32 to vector<2x128xf32>
    %44 = arith.addf %43, %42 : vector<2x128xf32>
    %45 = arith.divf %43, %44 : vector<2x128xf32>
    %46 = math.tanh %40 : vector<2x128xf32>
    %47 = vector.extract_strided_slice %45 {offsets = [0, 0], sizes = [2, 32], strides = [1, 1]} : vector<2x128xf32> to vector<2x32xf32>
    %48 = vector.extract_strided_slice %45 {offsets = [0, 32], sizes = [2, 32], strides = [1, 1]} : vector<2x128xf32> to vector<2x32xf32>
    %49 = vector.extract_strided_slice %46 {offsets = [0, 64], sizes = [2, 32], strides = [1, 1]} : vector<2x128xf32> to vector<2x32xf32>
    %50 = vector.extract_strided_slice %45 {offsets = [0, 96], sizes = [2, 32], strides = [1, 1]} : vector<2x128xf32> to vector<2x32xf32>
    %51 = arith.mulf %48, %35 : vector<2x32xf32>
    %52 = arith.mulf %47, %49 : vector<2x32xf32>
    %53 = arith.addf %51, %52 : vector<2x32xf32>
    %54 = math.tanh %53 : vector<2x32xf32>
    %55 = arith.mulf %50, %54 : vector<2x32xf32>
    %56 = arith.addf %38, %55 : vector<2x32xf32>
    %cst_17 = arith.constant dense<0.000000e+00> : vector<2x128xf32>
    %57 = tpu.matmul %55, %19, %cst_17 {dimension_numbers = #tpu.dot_dimension_numbers<[1], [0], [0], [1], [0, 0, 1, 1], [], []>} : vector<2x32xf32>, vector<32x128xf32>, vector<2x128xf32> -> vector<2x128xf32>
    %58 = arith.addf %13, %57 : vector<2x128xf32>
    %59 = arith.negf %58 : vector<2x128xf32>
    %60 = math.exp %59 : vector<2x128xf32>
    %cst_18 = arith.constant 1.000000e+00 : f32
    %61 = vector.broadcast %cst_18 : f32 to vector<2x128xf32>
    %62 = arith.addf %61, %60 : vector<2x128xf32>
    %63 = arith.divf %61, %62 : vector<2x128xf32>
    %64 = math.tanh %58 : vector<2x128xf32>
    %65 = vector.extract_strided_slice %63 {offsets = [0, 0], sizes = [2, 32], strides = [1, 1]} : vector<2x128xf32> to vector<2x32xf32>
    %66 = vector.extract_strided_slice %63 {offsets = [0, 32], sizes = [2, 32], strides = [1, 1]} : vector<2x128xf32> to vector<2x32xf32>
    %67 = vector.extract_strided_slice %64 {offsets = [0, 64], sizes = [2, 32], strides = [1, 1]} : vector<2x128xf32> to vector<2x32xf32>
    %68 = vector.extract_strided_slice %63 {offsets = [0, 96], sizes = [2, 32], strides = [1, 1]} : vector<2x128xf32> to vector<2x32xf32>
    %69 = arith.mulf %66, %53 : vector<2x32xf32>
    %70 = arith.mulf %65, %67 : vector<2x32xf32>
    %71 = arith.addf %69, %70 : vector<2x32xf32>
    %72 = math.tanh %71 : vector<2x32xf32>
    %73 = arith.mulf %68, %72 : vector<2x32xf32>
    %74 = arith.addf %56, %73 : vector<2x32xf32>
    %cst_19 = arith.constant dense<0.000000e+00> : vector<2x128xf32>
    %75 = tpu.matmul %73, %19, %cst_19 {dimension_numbers = #tpu.dot_dimension_numbers<[1], [0], [0], [1], [0, 0, 1, 1], [], []>} : vector<2x32xf32>, vector<32x128xf32>, vector<2x128xf32> -> vector<2x128xf32>
    %76 = arith.addf %14, %75 : vector<2x128xf32>
    %77 = arith.negf %76 : vector<2x128xf32>
    %78 = math.exp %77 : vector<2x128xf32>
    %cst_20 = arith.constant 1.000000e+00 : f32
    %79 = vector.broadcast %cst_20 : f32 to vector<2x128xf32>
    %80 = arith.addf %79, %78 : vector<2x128xf32>
    %81 = arith.divf %79, %80 : vector<2x128xf32>
    %82 = math.tanh %76 : vector<2x128xf32>
    %83 = vector.extract_strided_slice %81 {offsets = [0, 0], sizes = [2, 32], strides = [1, 1]} : vector<2x128xf32> to vector<2x32xf32>
    %84 = vector.extract_strided_slice %81 {offsets = [0, 32], sizes = [2, 32], strides = [1, 1]} : vector<2x128xf32> to vector<2x32xf32>
    %85 = vector.extract_strided_slice %82 {offsets = [0, 64], sizes = [2, 32], strides = [1, 1]} : vector<2x128xf32> to vector<2x32xf32>
    %86 = vector.extract_strided_slice %81 {offsets = [0, 96], sizes = [2, 32], strides = [1, 1]} : vector<2x128xf32> to vector<2x32xf32>
    %87 = arith.mulf %84, %71 : vector<2x32xf32>
    %88 = arith.mulf %83, %85 : vector<2x32xf32>
    %89 = arith.addf %87, %88 : vector<2x32xf32>
    %90 = math.tanh %89 : vector<2x32xf32>
    %91 = arith.mulf %86, %90 : vector<2x32xf32>
    %92 = arith.addf %74, %91 : vector<2x32xf32>
    %cst_21 = arith.constant dense<0.000000e+00> : vector<2x128xf32>
    %93 = tpu.matmul %91, %19, %cst_21 {dimension_numbers = #tpu.dot_dimension_numbers<[1], [0], [0], [1], [0, 0, 1, 1], [], []>} : vector<2x32xf32>, vector<32x128xf32>, vector<2x128xf32> -> vector<2x128xf32>
    %94 = arith.addf %15, %93 : vector<2x128xf32>
    %95 = arith.negf %94 : vector<2x128xf32>
    %96 = math.exp %95 : vector<2x128xf32>
    %cst_22 = arith.constant 1.000000e+00 : f32
    %97 = vector.broadcast %cst_22 : f32 to vector<2x128xf32>
    %98 = arith.addf %97, %96 : vector<2x128xf32>
    %99 = arith.divf %97, %98 : vector<2x128xf32>
    %100 = math.tanh %94 : vector<2x128xf32>
    %101 = vector.extract_strided_slice %99 {offsets = [0, 0], sizes = [2, 32], strides = [1, 1]} : vector<2x128xf32> to vector<2x32xf32>
    %102 = vector.extract_strided_slice %99 {offsets = [0, 32], sizes = [2, 32], strides = [1, 1]} : vector<2x128xf32> to vector<2x32xf32>
    %103 = vector.extract_strided_slice %100 {offsets = [0, 64], sizes = [2, 32], strides = [1, 1]} : vector<2x128xf32> to vector<2x32xf32>
    %104 = vector.extract_strided_slice %99 {offsets = [0, 96], sizes = [2, 32], strides = [1, 1]} : vector<2x128xf32> to vector<2x32xf32>
    %105 = arith.mulf %102, %89 : vector<2x32xf32>
    %106 = arith.mulf %101, %103 : vector<2x32xf32>
    %107 = arith.addf %105, %106 : vector<2x32xf32>
    %108 = math.tanh %107 : vector<2x32xf32>
    %109 = arith.mulf %104, %108 : vector<2x32xf32>
    %110 = arith.addf %92, %109 : vector<2x32xf32>
    %cst_23 = arith.constant dense<0.000000e+00> : vector<2x128xf32>
    %111 = tpu.matmul %109, %19, %cst_23 {dimension_numbers = #tpu.dot_dimension_numbers<[1], [0], [0], [1], [0, 0, 1, 1], [], []>} : vector<2x32xf32>, vector<32x128xf32>, vector<2x128xf32> -> vector<2x128xf32>
    %112 = arith.addf %16, %111 : vector<2x128xf32>
    %113 = arith.negf %112 : vector<2x128xf32>
    %114 = math.exp %113 : vector<2x128xf32>
    %cst_24 = arith.constant 1.000000e+00 : f32
    %115 = vector.broadcast %cst_24 : f32 to vector<2x128xf32>
    %116 = arith.addf %115, %114 : vector<2x128xf32>
    %117 = arith.divf %115, %116 : vector<2x128xf32>
    %118 = math.tanh %112 : vector<2x128xf32>
    %119 = vector.extract_strided_slice %117 {offsets = [0, 0], sizes = [2, 32], strides = [1, 1]} : vector<2x128xf32> to vector<2x32xf32>
    %120 = vector.extract_strided_slice %117 {offsets = [0, 32], sizes = [2, 32], strides = [1, 1]} : vector<2x128xf32> to vector<2x32xf32>
    %121 = vector.extract_strided_slice %118 {offsets = [0, 64], sizes = [2, 32], strides = [1, 1]} : vector<2x128xf32> to vector<2x32xf32>
    %122 = vector.extract_strided_slice %117 {offsets = [0, 96], sizes = [2, 32], strides = [1, 1]} : vector<2x128xf32> to vector<2x32xf32>
    %123 = arith.mulf %120, %107 : vector<2x32xf32>
    %124 = arith.mulf %119, %121 : vector<2x32xf32>
    %125 = arith.addf %123, %124 : vector<2x32xf32>
    %126 = math.tanh %125 : vector<2x32xf32>
    %127 = arith.mulf %122, %126 : vector<2x32xf32>
    %128 = arith.addf %110, %127 : vector<2x32xf32>
    %cst_25 = arith.constant dense<0.000000e+00> : vector<2x128xf32>
    %129 = tpu.matmul %127, %19, %cst_25 {dimension_numbers = #tpu.dot_dimension_numbers<[1], [0], [0], [1], [0, 0, 1, 1], [], []>} : vector<2x32xf32>, vector<32x128xf32>, vector<2x128xf32> -> vector<2x128xf32>
    %130 = arith.addf %17, %129 : vector<2x128xf32>
    %131 = arith.negf %130 : vector<2x128xf32>
    %132 = math.exp %131 : vector<2x128xf32>
    %cst_26 = arith.constant 1.000000e+00 : f32
    %133 = vector.broadcast %cst_26 : f32 to vector<2x128xf32>
    %134 = arith.addf %133, %132 : vector<2x128xf32>
    %135 = arith.divf %133, %134 : vector<2x128xf32>
    %136 = math.tanh %130 : vector<2x128xf32>
    %137 = vector.extract_strided_slice %135 {offsets = [0, 0], sizes = [2, 32], strides = [1, 1]} : vector<2x128xf32> to vector<2x32xf32>
    %138 = vector.extract_strided_slice %135 {offsets = [0, 32], sizes = [2, 32], strides = [1, 1]} : vector<2x128xf32> to vector<2x32xf32>
    %139 = vector.extract_strided_slice %136 {offsets = [0, 64], sizes = [2, 32], strides = [1, 1]} : vector<2x128xf32> to vector<2x32xf32>
    %140 = vector.extract_strided_slice %135 {offsets = [0, 96], sizes = [2, 32], strides = [1, 1]} : vector<2x128xf32> to vector<2x32xf32>
    %141 = arith.mulf %138, %125 : vector<2x32xf32>
    %142 = arith.mulf %137, %139 : vector<2x32xf32>
    %143 = arith.addf %141, %142 : vector<2x32xf32>
    %144 = math.tanh %143 : vector<2x32xf32>
    %145 = arith.mulf %140, %144 : vector<2x32xf32>
    %146 = arith.addf %128, %145 : vector<2x32xf32>
    %cst_27 = arith.constant dense<0.000000e+00> : vector<2x128xf32>
    %147 = tpu.matmul %145, %19, %cst_27 {dimension_numbers = #tpu.dot_dimension_numbers<[1], [0], [0], [1], [0, 0, 1, 1], [], []>} : vector<2x32xf32>, vector<32x128xf32>, vector<2x128xf32> -> vector<2x128xf32>
    %148 = arith.addf %18, %147 : vector<2x128xf32>
    %149 = arith.negf %148 : vector<2x128xf32>
    %150 = math.exp %149 : vector<2x128xf32>
    %cst_28 = arith.constant 1.000000e+00 : f32
    %151 = vector.broadcast %cst_28 : f32 to vector<2x128xf32>
    %152 = arith.addf %151, %150 : vector<2x128xf32>
    %153 = arith.divf %151, %152 : vector<2x128xf32>
    %154 = math.tanh %148 : vector<2x128xf32>
    %155 = vector.extract_strided_slice %153 {offsets = [0, 0], sizes = [2, 32], strides = [1, 1]} : vector<2x128xf32> to vector<2x32xf32>
    %156 = vector.extract_strided_slice %153 {offsets = [0, 32], sizes = [2, 32], strides = [1, 1]} : vector<2x128xf32> to vector<2x32xf32>
    %157 = vector.extract_strided_slice %154 {offsets = [0, 64], sizes = [2, 32], strides = [1, 1]} : vector<2x128xf32> to vector<2x32xf32>
    %158 = vector.extract_strided_slice %153 {offsets = [0, 96], sizes = [2, 32], strides = [1, 1]} : vector<2x128xf32> to vector<2x32xf32>
    %159 = arith.mulf %156, %143 : vector<2x32xf32>
    %160 = arith.mulf %155, %157 : vector<2x32xf32>
    %161 = arith.addf %159, %160 : vector<2x32xf32>
    %162 = math.tanh %161 : vector<2x32xf32>
    %163 = arith.mulf %158, %162 : vector<2x32xf32>
    %164 = arith.addf %146, %163 : vector<2x32xf32>
    %c0_29 = arith.constant 0 : index
    %c0_30 = arith.constant 0 : index
    %165 = vector.load %arg6[%c0_29, %c0_30] : memref<2x1xf32, #tpu.memory_space<vmem>>, vector<2x1xf32>
    %166 = vector.broadcast %165 : vector<2x1xf32> to vector<2x32xf32>
    %167 = arith.divf %164, %166 : vector<2x32xf32>
    %c0_31 = arith.constant 0 : index
    %c0_32 = arith.constant 0 : index
    %168 = vector.load %arg7[%c0_31, %c0_32] : memref<2x1xf32, #tpu.memory_space<vmem>>, vector<2x1xf32>
    %169 = tpu.concatenate %167, %168 in 1 : vector<2x32xf32>, vector<2x1xf32> -> vector<2x33xf32>
    %c0_33 = arith.constant 0 : index
    %c0_34 = arith.constant 0 : index
    %170 = vector.load %arg8[%c0_33, %c0_34] : memref<33x20xf32, #tpu.memory_space<vmem>>, vector<33x20xf32>
    %cst_35 = arith.constant dense<0.000000e+00> : vector<2x20xf32>
    %171 = tpu.matmul %169, %170, %cst_35 {dimension_numbers = #tpu.dot_dimension_numbers<[1], [0], [0], [1], [0, 0, 1, 1], [], []>} : vector<2x33xf32>, vector<33x20xf32>, vector<2x20xf32> -> vector<2x20xf32>
    %c0_36 = arith.constant 0 : index
    %c0_37 = arith.constant 0 : index
    %172 = vector.load %arg9[%c0_36, %c0_37] : memref<1x20xf32, #tpu.memory_space<vmem>>, vector<1x20xf32>
    %173 = vector.broadcast %172 : vector<1x20xf32> to vector<2x20xf32>
    %174 = arith.addf %171, %173 : vector<2x20xf32>
    %cst_38 = arith.constant dense<0.000000e+00> : vector<20xf32>
    %175 = vector.multi_reduction <add>, %174, %cst_38 [0] : vector<2x20xf32> to vector<20xf32>
    %176 = vector.shape_cast %175 : vector<20xf32> to vector<1x20xf32>
    %cst_39 = arith.constant 2.000000e+00 : f32
    %177 = vector.broadcast %cst_39 : f32 to vector<1x20xf32>
    %178 = arith.divf %176, %177 : vector<1x20xf32>
    %179 = vector.broadcast %178 : vector<1x20xf32> to vector<2x20xf32>
    %180 = arith.subf %174, %179 : vector<2x20xf32>
    %181 = arith.mulf %180, %180 : vector<2x20xf32>
    %cst_40 = arith.constant dense<0.000000e+00> : vector<20xf32>
    %182 = vector.multi_reduction <add>, %181, %cst_40 [0] : vector<2x20xf32> to vector<20xf32>
    %183 = vector.shape_cast %182 : vector<20xf32> to vector<1x20xf32>
    %cst_41 = arith.constant 2.000000e+00 : f32
    %184 = vector.broadcast %cst_41 : f32 to vector<1x20xf32>
    %185 = arith.divf %183, %184 : vector<1x20xf32>
    %c0_42 = arith.constant 0 : index
    %c0_43 = arith.constant 0 : index
    %186 = vector.load %arg10[%c0_42, %c0_43] : memref<1x20xf32, #tpu.memory_space<vmem>>, vector<1x20xf32>
    %187 = vector.broadcast %178 : vector<1x20xf32> to vector<2x20xf32>
    %188 = arith.subf %174, %187 : vector<2x20xf32>
    %189 = vector.broadcast %186 : vector<1x20xf32> to vector<2x20xf32>
    %190 = arith.mulf %189, %188 : vector<2x20xf32>
    %cst_44 = arith.constant 9.99999974E-6 : f32
    %191 = vector.broadcast %cst_44 : f32 to vector<1x20xf32>
    %192 = arith.addf %185, %191 : vector<1x20xf32>
    %193 = math.rsqrt %192 : vector<1x20xf32>
    %194 = vector.broadcast %193 : vector<1x20xf32> to vector<2x20xf32>
    %195 = arith.mulf %190, %194 : vector<2x20xf32>
    %c0_45 = arith.constant 0 : index
    %c0_46 = arith.constant 0 : index
    %196 = vector.load %arg11[%c0_45, %c0_46] : memref<1x20xf32, #tpu.memory_space<vmem>>, vector<1x20xf32>
    %197 = vector.broadcast %196 : vector<1x20xf32> to vector<2x20xf32>
    %198 = arith.addf %195, %197 : vector<2x20xf32>
    %cst_47 = arith.constant 0.000000e+00 : f32
    %199 = vector.broadcast %cst_47 : f32 to vector<2x20xf32>
    %200 = arith.cmpf ogt, %198, %199 : vector<2x20xf32>
    %cst_48 = arith.constant 0.00999999977 : f32
    %201 = vector.broadcast %cst_48 : f32 to vector<2x20xf32>
    %202 = arith.mulf %201, %198 : vector<2x20xf32>
    %203 = arith.select %200, %198, %202 : vector<2x20xi1>, vector<2x20xf32>
    %c0_49 = arith.constant 0 : index
    %c0_50 = arith.constant 0 : index
    %204 = vector.load %arg12[%c0_49, %c0_50] : memref<20x20xf32, #tpu.memory_space<vmem>>, vector<20x20xf32>
    %cst_51 = arith.constant dense<0.000000e+00> : vector<2x20xf32>
    %205 = tpu.matmul %203, %204, %cst_51 {dimension_numbers = #tpu.dot_dimension_numbers<[1], [0], [0], [1], [0, 0, 1, 1], [], []>} : vector<2x20xf32>, vector<20x20xf32>, vector<2x20xf32> -> vector<2x20xf32>
    %c0_52 = arith.constant 0 : index
    %c0_53 = arith.constant 0 : index
    %206 = vector.load %arg13[%c0_52, %c0_53] : memref<1x20xf32, #tpu.memory_space<vmem>>, vector<1x20xf32>
    %207 = vector.broadcast %206 : vector<1x20xf32> to vector<2x20xf32>
    %208 = arith.addf %205, %207 : vector<2x20xf32>
    %cst_54 = arith.constant 0.000000e+00 : f32
    %209 = vector.broadcast %cst_54 : f32 to vector<2x20xf32>
    %210 = arith.cmpf ogt, %208, %209 : vector<2x20xf32>
    %cst_55 = arith.constant 0.00999999977 : f32
    %211 = vector.broadcast %cst_55 : f32 to vector<2x20xf32>
    %212 = arith.mulf %211, %208 : vector<2x20xf32>
    %213 = arith.select %210, %208, %212 : vector<2x20xi1>, vector<2x20xf32>
    %c0_56 = arith.constant 0 : index
    %c0_57 = arith.constant 0 : index
    %214 = vector.load %arg14[%c0_56, %c0_57] : memref<20x20xf32, #tpu.memory_space<vmem>>, vector<20x20xf32>
    %cst_58 = arith.constant dense<0.000000e+00> : vector<2x20xf32>
    %215 = tpu.matmul %213, %214, %cst_58 {dimension_numbers = #tpu.dot_dimension_numbers<[1], [0], [0], [1], [0, 0, 1, 1], [], []>} : vector<2x20xf32>, vector<20x20xf32>, vector<2x20xf32> -> vector<2x20xf32>
    %c0_59 = arith.constant 0 : index
    %c0_60 = arith.constant 0 : index
    %216 = vector.load %arg15[%c0_59, %c0_60] : memref<1x20xf32, #tpu.memory_space<vmem>>, vector<1x20xf32>
    %217 = vector.broadcast %216 : vector<1x20xf32> to vector<2x20xf32>
    %218 = arith.addf %215, %217 : vector<2x20xf32>
    %cst_61 = arith.constant 0.000000e+00 : f32
    %219 = vector.broadcast %cst_61 : f32 to vector<2x20xf32>
    %220 = arith.cmpf ogt, %218, %219 : vector<2x20xf32>
    %cst_62 = arith.constant 0.00999999977 : f32
    %221 = vector.broadcast %cst_62 : f32 to vector<2x20xf32>
    %222 = arith.mulf %221, %218 : vector<2x20xf32>
    %223 = arith.select %220, %218, %222 : vector<2x20xi1>, vector<2x20xf32>
    %c0_63 = arith.constant 0 : index
    %c0_64 = arith.constant 0 : index
    %224 = vector.load %arg16[%c0_63, %c0_64] : memref<20x1xf32, #tpu.memory_space<vmem>>, vector<20x1xf32>
    %cst_65 = arith.constant dense<0.000000e+00> : vector<2x1xf32>
    %225 = tpu.matmul %223, %224, %cst_65 {dimension_numbers = #tpu.dot_dimension_numbers<[1], [0], [0], [1], [0, 0, 1, 1], [], []>} : vector<2x20xf32>, vector<20x1xf32>, vector<2x1xf32> -> vector<2x1xf32>
    %c0_66 = arith.constant 0 : index
    %c0_67 = arith.constant 0 : index
    %226 = vector.load %arg17[%c0_66, %c0_67] : memref<1x1xf32, #tpu.memory_space<vmem>>, vector<1x1xf32>
    %227 = vector.broadcast %226 : vector<1x1xf32> to vector<2x1xf32>
    %228 = arith.addf %225, %227 : vector<2x1xf32>
    %c0_68 = arith.constant 0 : index
    %c0_69 = arith.constant 0 : index
    %229 = vector.load %arg18[%c0_68, %c0_69] : memref<2x1xf32, #tpu.memory_space<vmem>>, vector<2x1xf32>
    tpu.vector_store %arg18[%c0_68, %c0_69], %228 {strides = array<i32>} : memref<2x1xf32, #tpu.memory_space<vmem>>, vector<2x1xf32>,
    return
  }
}

</mosaic_0001>

<bundles_post_ra>
// kernel: mlpenet_forward.1
= control target key start
LH: loop header
LB: loop body
LE: loop exit
PB: predicated region body
PF: predicated region fallthrough
CT: control target
= control target key end

     0   :  { %vm79_vm0 = vcmask 1043456   ;;  %vm72_vm1 = vcmask 97280   ;;  %vm1959_vm2 = vmmov 1   ;;  %v1960_v13 = vmov 0.0|0.0   ;;  %s1963_s19 = smov 64   ;;  %s2317_s1 = inlined_call_operand.vmem [shape: f32[12,50], index: 1, kind: input, shape index: {}]   ;;  %s2318_s0 = inlined_call_operand.vmem [shape: f32[16,12], index: 0, kind: input, shape index: {}]   ;;  %s2319_s3 = inlined_call_operand.vmem [shape: f32[50,128], index: 3, kind: input, shape index: {}]   ;;  %s2320_s4 = inlined_call_operand.vmem [shape: f32[32,128], index: 4, kind: input, shape index: {}]   ;;  %s2321_s2 = inlined_call_operand.vmem [shape: f32[1,50], index: 2, kind: input, shape index: {}]   ;;  %s2322_s5 = inlined_call_operand.vmem [shape: f32[1,128], index: 5, kind: input, shape index: {}]   ;;  %s2323_s6 = inlined_call_operand.vmem [shape: f32[2,1], index: 6, kind: input, shape index: {}]   ;;  %s2324_s7 = inlined_call_operand.vmem [shape: f32[2,1], index: 7, kind: input, shape index: {}]   ;;  %s2325_s8 = inlined_call_operand.vmem [shape: f32[33,20], index: 8, kind: input, shape index: {}]   ;;  %s2326_s12 = inlined_call_operand.vmem [shape: f32[20,20], index: 12, kind: input, shape index: {}]   ;;  %s2327_s9 = inlined_call_operand.vmem [shape: f32[1,20], index: 9, kind: input, shape index: {}]   ;;  %s2328_s10 = inlined_call_operand.vmem [shape: f32[1,20], index: 10, kind: input, shape index: {}]   ;;  %s2329_s11 = inlined_call_operand.vmem [shape: f32[1,20], index: 11, kind: input, shape index: {}]   ;;  %s2330_s14 = inlined_call_operand.vmem [shape: f32[20,20], index: 14, kind: input, shape index: {}]   ;;  %s2331_s13 = inlined_call_operand.vmem [shape: f32[1,20], index: 13, kind: input, shape index: {}]   ;;  %s2332_s16 = inlined_call_operand.vmem [shape: f32[20,1], index: 16, kind: input, shape index: {}]   ;;  %s2333_s17 = inlined_call_operand.<no memory space> [shape: f32[1,1], index: 17, kind: input, shape index: {}]   ;;  %s2334_s15 = inlined_call_operand.vmem [shape: f32[1,20], index: 15, kind: input, shape index: {}]   ;;  %s2335_s18 = inlined_call_operand.vmem [shape: f32[2,1], index: 18, kind: output, shape index: {}]  }
   0x1   :  { %2339 = sst [smem:[#allocation3_spill]] %s2317_s1  ;;  %vm1803_vm3 = vmpackc.low %vm79_vm0, %vm1959_vm2  ;;  %v258_v15 = vld [vmem:[%s2320_s4] sm:$0xff]  ;;  %v259_v16 = vld [vmem:[%s2320_s4 + $0x8] sm:$0xff]  ;;  %vm179_vm4 = vcmask 1041408   ;;  %vm1961_vm5 = vmmov 0   ;;  %v1962_v22 = vmov 0.0  }
   0x2   :  { %2340 = sst [smem:[#allocation4_spill]] %s2318_s0  ;;  %s2342_s29 = sld [smem:[#allocation3_spill]]  ;;  %v2101_v17 = vpack.c.bf16 %v259_v16, %v258_v15  ;;  %v260_v18 = vld [vmem:[%s2320_s4 + $0x10] sm:$0xff]  ;;  %v261_v19 = vld [vmem:[%s2320_s4 + $0x18] sm:$0xff]  ;;  %v1542_v23 = vld [vmem:[%s2321_s2] ss:$0 sm:$0xff] }
   0x3   :  { %2341 = sst [smem:[#allocation5_spill]] %s2319_s3  ;;  %s2343_s20 = sld [smem:[#allocation4_spill]]  ;;  %v2114_v21 = vpack.c.bf16 %v261_v19, %v260_v18  ;;  %vm172_vm6 = vcmask 408576   ;;  %v1546_v30 = vld [vmem:[%s2322_s5] ss:$0 sm:$0xff]  ;;  %vm262_vm7 = vcmask 261120  }
   0x4   :  { %s2344_s3 = sld [smem:[#allocation5_spill]]  ;;  %s1964_s5 = smov 32   ;;  %vm1155_vm8 = vcmask 1040384   ;;  %vm1151_vm9 = vcmask 269312   ;;  %vm1229_vm10 = vcmask 156672   ;;  %vm1281_vm12 = vcmask 162816  }
   0x5   :  { %vm1536_vm15 = vcmask 1024  }
   0x8   :  { %v63_v0 = vld [vmem:[%s2342_s29] sm:$0xff]  ;;  %v64_v1 = vld [vmem:[%s2342_s29 + $0x8] sm:$0xf] }
   0x9   :  { %v1802_v2 = vpack.c.bf16 %v64_v1, %v63_v0  ;;  %v61_v3 = vld [vmem:[%s2343_s20] sm:$0xff]  ;;  %v62_v10 = vld [vmem:[%s2343_s20 + $0x8] sm:$0xff] }
   0xa   :  { %v158_v4 = vld [vmem:[%s2344_s3] sm:$0xff]  ;;  %1654 = vmatprep.mubr.msk.f32.mxu0 %vm72_vm1, %v61_v3  ;;  %v159_v5 = vld [vmem:[%s2344_s3 + $0x8] sm:$0xff]  ;;  %v160_v6 = vld [vmem:[%s2344_s3 + $0x10] sm:$0xff] }
   0xb   :  { %v161_v7 = vld [vmem:[%s2344_s3 + $0x18] sm:$0xff]  ;;  %1804 = vmatprep.subr.msk.bf16.mxu0 %vm1803_vm3, %v1802_v2  ;;  %v1808_v8 = vpack.c.bf16 %v159_v5, %v158_v4  ;;  %v162_v11 = vld [vmem:[%s2344_s3 + $0x20] sm:$0xff]  ;;  %v163_v12 = vld [vmem:[%s2344_s3 + $0x28] sm:$0xff] }
   0xc   :  { %v1812_v9 = vpack.c.bf16 %v161_v7, %v160_v6  ;;  %1807 = vmatpush3.bf16.msk.msra.mxu0 %vm1803_vm3, %v1802_v2  ;;  %v1816_v14 = vpack.c.bf16 %v163_v12, %v162_v11  ;;  %v164_v20 = vld [vmem:[%s2344_s3 + $0x30] sm:$0x3] }
   0xd   :  { %1809 = vmatprep.subr.bf16.mxu1 %v1808_v8  ;;  %1820 = vmatprep.subr.bf16.mxu0 %v1960_v13 }
   0xe   :  { %1811 = vmatpush3.bf16.msra.mxu1 %v1808_v8 }
   0xf   :  { %1655 = vmatmul.mubr.msk.f32.vlgmr.msra.gmra.mrb[0].mxu0 %vm72_vm1, %v62_v10  ;;  %1813 = vmatprep.subr.bf16.mxu1 %v1812_v9 }
  0x10   :  { %1822 = vmatpush3.bf16.msra.mxu0 %v2101_v17  ;;  %1682 = vmatprep.mubr.msk.f32.mxu0 %vm1961_vm5, %v1962_v22 }
  0x11   :  { %1823 = vmatprep.subr.bf16.mxu0 %v1960_v13 }
  0x12   :  { %1815 = vmatpush3.bf16.msra.mxu1 %v1812_v9 }
  0x13   :  { %1817 = vmatprep.subr.bf16.mxu1 %v1816_v14 }
  0x14   :  { %1825 = vmatpush3.bf16.msra.mxu0 %v2114_v21 }
  0x15   :  { %1826 = vmatprep.subr.bf16.mxu0 %v1960_v13 }
  0x16   :  { %1819 = vmatpush3.bf16.msra.mxu1 %v1816_v14 }
  0x17   :  { %1669 = vmatprep.subr.msk.mxu1 %vm179_vm4, %v164_v20  ;;  %1683 = vmatmul.mubr.f32.vlgmr.msra.gmra.mrb[2].mxu0 %v1962_v22 }
  0x18   :  { %1828 = vmatpush3.bf16.msra.mxu0 %v2101_v17  ;;  %1693 = vmatprep.mubr.msk.f32.mxu0 %vm1961_vm5, %v1962_v22 }
  0x19   :  { %1829 = vmatprep.subr.bf16.mxu0 %v1960_v13 }
  0x1a   :  { %1670 = vmatpush3.msk.msra.mxu1 %vm179_vm4, %v164_v20 }
  0x1b   :  { %1832 = vmatprep.subr.bf16.mxu1 %v1960_v13 }
  0x1c   :  { %1831 = vmatpush3.bf16.msra.mxu0 %v2114_v21 }
  0x1d   :  { %1838 = vmatprep.subr.bf16.mxu0 %v1960_v13 }
  0xe2   :  { %v1656_v24 = vpop.f32.mrb[0].mxu0 }
  0xe3   :  { %v149_v25 = vpop.f32.mrb[1].mxu0  ;;  %v155_v27 = vadd.f32 %v1656_v24, %v1542_v23 }
  0xe4   :  { %v150_v26 = vadd.f32 %v1542_v23, %v149_v25 }
  0xe6   :  { %1671 = vmatprep.mubr.msk.f32.mxu1 %vm172_vm6, %v150_v26 }
  0xe7   :  { %1672 = vmatmul.mubr.msk.f32.vlgmr.msra.gmra.mrb[0].mxu1 %vm172_vm6, %v155_v27 }
  0xe8   :  { %1834 = vmatpush3.bf16.msra.mxu1 %v2101_v17  ;;  %1704 = vmatprep.mubr.msk.f32.mxu1 %vm1961_vm5, %v1962_v22 }
  0xe9   :  { %1835 = vmatprep.subr.bf16.mxu1 %v1960_v13 }
  0xea   :  { %v332_v28 = vpop.f32.mrb[2].mxu0 }
  0xeb   :  { %v1684_v29 = vpop.f32.mrb[3].mxu0 }
  0xec   :  { %1837 = vmatpush3.bf16.msra.mxu1 %v2114_v21 }
  0xed   :  { %1844 = vmatprep.subr.bf16.mxu1 %v1960_v13 }
 0x1ba   :  { %v1673_v31 = vpop.f32.mrb[0].mxu1 }
 0x1bb   :  { %v2140_v32 = vadd.f32 %v1673_v31, %v1546_v30  ;;  %v249_v33 = vpop.f32.mrb[1].mxu1 }
 0x1bc   :  { %v2142_v34 = vadd.f32 %v1546_v30, %v249_v33 }
 0x1be   :  { %v336_v35 = vadd.f32 %v332_v28, %v2142_v34 }
 0x1c0   :  { %1891 = vtanh.f32 %v336_v35  ;;  %v1550_v37 = vmul.f32 -1.442695, %v336_v35 }
 0x1c2   :  { %1893 = vpow2.f32 %v1550_v37 }
 0x1ca   :  { %v1892_v36 = vpop.eup %1891 }
 0x1cb   :  { %346 = vrot.lane.b32.xlu0 %v1892_v36, %s1963_s19 }
 0x1cc   :  { %v1894_v38 = vpop.eup %1893 }
 0x1cd   :  { %v340_v39 = vadd.f32 1.0, %v1894_v38 }
 0x1cf   :  { %1895 = vrcp.f32 %v340_v39 }
 0x1d9   :  { %v1896_v40 = vpop.eup %1895 }
 0x1da   :  { %v344_v43 = vmul.f32 0.0, %v1896_v40 }
 0x23d   :  { %v347_v41 = vpop.permute.xlu0 %346 }
 0x23e   :  { %v349_v42 = vmul.f32 %v1896_v40, %v347_v41 }
 0x240   :  { %351 = vrot.lane.b32.xlu0 %v349_v42, %s1964_s5 }
 0x2b2   :  { %v352_v44 = vpop.permute.xlu0 %351 }
 0x2b3   :  { %v354_v45 = vadd.f32 %v352_v44, %v344_v43 }
 0x2b5   :  { %1897 = vtanh.f32 %v354_v45  ;;  %v449_v61 = vrot.slane %v354_v45, 6 }
 0x2bf   :  { %v1898_v46 = vpop.eup %1897 }
 0x2c0   :  { %357 = vrot.lane.b32.xlu1 %v1898_v46, %s1963_s19 }
 0x332   :  { %v358_v47 = vpop.permute.xlu1 %357 }
 0x333   :  { %v2148_v48 = vmul.f32 %v1896_v40, %v358_v47 }
 0x335   :  { %363 = vrot.lane.b32.xlu1 %v2148_v48, %s1964_s5 }
 0x3a7   :  { %v364_v49 = vpop.permute.xlu1 %363 }
 0x3a8   :  { %1694 = vmatmul.mubr.msk.f32.vlgmr.msra.gmra.mrb[4].mxu0 %vm262_vm7, %v364_v49 }
 0x3a9   :  { %1840 = vmatpush3.bf16.msra.mxu0 %v2101_v17  ;;  %1715 = vmatprep.mubr.msk.f32.mxu0 %vm1961_vm5, %v1962_v22 }
 0x3aa   :  { %1841 = vmatprep.subr.bf16.mxu0 %v1960_v13 }
 0x3ad   :  { %1843 = vmatpush3.bf16.msra.mxu0 %v2114_v21 }
 0x3ae   :  { %1850 = vmatprep.subr.bf16.mxu0 %v1960_v13 }
 0x47b   :  { %v433_v50 = vpop.f32.mrb[4].mxu0 }
 0x47c   :  { %v438_v51 = vrot.slane %v433_v50, 6  ;;  %v1695_v52 = vpop.f32.mrb[5].mxu0 }
 0x47e   :  { %v440_v53 = vadd.f32 %v438_v51, %v2142_v34 }
 0x480   :  { %1899 = vtanh.f32 %v440_v53  ;;  %v1552_v55 = vmul.f32 -1.442695, %v440_v53 }
 0x482   :  { %1901 = vpow2.f32 %v1552_v55 }
 0x48a   :  { %v1900_v54 = vpop.eup %1899 }
 0x48b   :  { %453 = vrot.lane.b32.xlu0 %v1900_v54, %s1963_s19 }
 0x48c   :  { %v1902_v56 = vpop.eup %1901 }
 0x48d   :  { %v444_v57 = vadd.f32 1.0, %v1902_v56 }
 0x48f   :  { %1903 = vrcp.f32 %v444_v57 }
 0x499   :  { %v1904_v58 = vpop.eup %1903 }
 0x49a   :  { %v451_v62 = vmul.f32 %v1904_v58, %v449_v61 }
 0x4fd   :  { %v454_v59 = vpop.permute.xlu0 %453 }
 0x4fe   :  { %v456_v60 = vmul.f32 %v1904_v58, %v454_v59 }
 0x500   :  { %458 = vrot.lane.b32.xlu1 %v456_v60, %s1964_s5 }
 0x572   :  { %v459_v63 = vpop.permute.xlu1 %458 }
 0x573   :  { %v461_v0 = vadd.f32 %v459_v63, %v451_v62 }
 0x575   :  { %1905 = vtanh.f32 %v461_v0  ;;  %v558_v19 = vrot.slane %v461_v0, 6 }
 0x57f   :  { %v1906_v1 = vpop.eup %1905 }
 0x580   :  { %464 = vrot.lane.b32.xlu0 %v1906_v1, %s1963_s19 }
 0x5f2   :  { %v465_v2 = vpop.permute.xlu0 %464 }
 0x5f3   :  { %v467_v3 = vmul.f32 %v1904_v58, %v465_v2 }
 0x5f5   :  { %v469_v4 = vrot.slane %v467_v3, 2 }
 0x5f7   :  { %472 = vrot.lane.b32.xlu1 %v469_v4, %s1964_s5  ;;  %v471_v28 = vadd.f32 %v469_v4, %v2148_v48 }
 0x669   :  { %v473_v5 = vpop.permute.xlu1 %472 }
 0x66a   :  { %1705 = vmatmul.mubr.msk.f32.vlgmr.msra.gmra.mrb[2].mxu1 %vm262_vm7, %v473_v5 }
 0x66b   :  { %1846 = vmatpush3.bf16.msra.mxu1 %v2101_v17  ;;  %1726 = vmatprep.mubr.msk.f32.mxu1 %vm1961_vm5, %v1962_v22 }
 0x66c   :  { %1847 = vmatprep.subr.bf16.mxu1 %v1960_v13 }
 0x66f   :  { %1849 = vmatpush3.bf16.msra.mxu1 %v2114_v21 }
 0x670   :  { %1856 = vmatprep.subr.bf16.mxu1 %v1960_v13 }
 0x73d   :  { %v542_v6 = vpop.f32.mrb[2].mxu1 }
 0x73e   :  { %v547_v7 = vrot.slane %v542_v6, 4  ;;  %v1706_v8 = vpop.f32.mrb[3].mxu1 }
 0x740   :  { %v549_v9 = vadd.f32 %v547_v7, %v2142_v34 }
 0x742   :  { %1907 = vtanh.f32 %v549_v9  ;;  %v1554_v11 = vmul.f32 -1.442695, %v549_v9 }
 0x744   :  { %1909 = vpow2.f32 %v1554_v11 }
 0x74c   :  { %v1908_v10 = vpop.eup %1907 }
 0x74d   :  { %562 = vrot.lane.b32.xlu0 %v1908_v10, %s1963_s19 }
 0x74e   :  { %v1910_v12 = vpop.eup %1909 }
 0x74f   :  { %v553_v14 = vadd.f32 1.0, %v1910_v12 }
 0x751   :  { %1911 = vrcp.f32 %v553_v14 }
 0x75b   :  { %v1912_v15 = vpop.eup %1911 }
 0x75c   :  { %v560_v20 = vmul.f32 %v1912_v15, %v558_v19 }
 0x7bf   :  { %v563_v16 = vpop.permute.xlu0 %562 }
 0x7c0   :  { %v565_v18 = vmul.f32 %v1912_v15, %v563_v16 }
 0x7c2   :  { %567 = vrot.lane.b32.xlu1 %v565_v18, %s1964_s5 }
 0x834   :  { %v568_v23 = vpop.permute.xlu1 %567 }
 0x835   :  { %v570_v24 = vadd.f32 %v568_v23, %v560_v20 }
 0x837   :  { %1913 = vtanh.f32 %v570_v24  ;;  %v667_v45 = vrot.slane %v570_v24, 6 }
 0x841   :  { %v1914_v25 = vpop.eup %1913 }
 0x842   :  { %573 = vrot.lane.b32.xlu0 %v1914_v25, %s1963_s19 }
 0x8b4   :  { %v574_v26 = vpop.permute.xlu0 %573 }
 0x8b5   :  { %v576_v27 = vmul.f32 %v1912_v15, %v574_v26 }
 0x8b7   :  { %v578_v29 = vrot.slane %v576_v27, 4 }
 0x8b9   :  { %v580_v30 = vadd.f32 %v578_v29, %v471_v28  ;;  %581 = vrot.lane.b32.xlu1 %v578_v29, %s1964_s5 }
 0x92b   :  { %v582_v31 = vpop.permute.xlu1 %581 }
 0x92c   :  { %1716 = vmatmul.mubr.msk.f32.vlgmr.msra.gmra.mrb[6].mxu0 %vm262_vm7, %v582_v31 }
 0x92d   :  { %1852 = vmatpush3.bf16.msra.mxu0 %v2101_v17  ;;  %1737 = vmatprep.mubr.msk.f32.mxu0 %vm1961_vm5, %v1962_v22 }
 0x92e   :  { %1853 = vmatprep.subr.bf16.mxu0 %v1960_v13 }
 0x931   :  { %1855 = vmatpush3.bf16.msra.mxu0 %v2114_v21 }
 0x932   :  { %1862 = vmatprep.subr.bf16.mxu0 %v1960_v13 }
 0x9ff   :  { %v651_v33 = vpop.f32.mrb[6].mxu0 }
 0xa00   :  { %v656_v35 = vrot.slane %v651_v33, 2  ;;  %v1717_v36 = vpop.f32.mrb[7].mxu0 }
 0xa02   :  { %v658_v37 = vadd.f32 %v656_v35, %v2142_v34 }
 0xa04   :  { %1915 = vtanh.f32 %v658_v37  ;;  %v1556_v39 = vmul.f32 -1.442695, %v658_v37 }
 0xa06   :  { %1917 = vpow2.f32 %v1556_v39 }
 0xa0e   :  { %v1916_v38 = vpop.eup %1915 }
 0xa0f   :  { %671 = vrot.lane.b32.xlu0 %v1916_v38, %s1963_s19 }
 0xa10   :  { %v1918_v40 = vpop.eup %1917 }
 0xa11   :  { %v662_v41 = vadd.f32 1.0, %v1918_v40 }
 0xa13   :  { %1919 = vrcp.f32 %v662_v41 }
 0xa1d   :  { %v1920_v42 = vpop.eup %1919 }
 0xa1e   :  { %v669_v46 = vmul.f32 %v1920_v42, %v667_v45 }
 0xa81   :  { %v672_v43 = vpop.permute.xlu0 %671 }
 0xa82   :  { %v674_v44 = vmul.f32 %v1920_v42, %v672_v43 }
 0xa84   :  { %676 = vrot.lane.b32.xlu1 %v674_v44, %s1964_s5 }
 0xaf6   :  { %v677_v47 = vpop.permute.xlu1 %676 }
 0xaf7   :  { %v679_v48 = vadd.f32 %v677_v47, %v669_v46 }
 0xaf9   :  { %1921 = vtanh.f32 %v679_v48  ;;  %v773_v0 = vrot.slane %v679_v48, 6 }
 0xb03   :  { %v1922_v34 = vpop.eup %1921 }
 0xb04   :  { %682 = vrot.lane.b32.xlu0 %v1922_v34, %s1963_s19 }
 0xb76   :  { %v683_v49 = vpop.permute.xlu0 %682 }
 0xb77   :  { %v685_v50 = vmul.f32 %v1920_v42, %v683_v49 }
 0xb79   :  { %v687_v51 = vrot.slane %v685_v50, 6 }
 0xb7b   :  { %v689_v52 = vadd.f32 %v687_v51, %v580_v30  ;;  %690 = vrot.lane.b32.xlu1 %v687_v51, %s1964_s5 }
 0xbed   :  { %v691_v53 = vpop.permute.xlu1 %690 }
 0xbee   :  { %1727 = vmatmul.mubr.msk.f32.vlgmr.msra.gmra.mrb[4].mxu1 %vm262_vm7, %v691_v53 }
 0xbef   :  { %1858 = vmatpush3.bf16.msra.mxu1 %v2101_v17  ;;  %1748 = vmatprep.mubr.msk.f32.mxu1 %vm1961_vm5, %v1962_v22 }
 0xbf0   :  { %1859 = vmatprep.subr.bf16.mxu1 %v1960_v13 }
 0xbf3   :  { %1861 = vmatpush3.bf16.msra.mxu1 %v2114_v21 }
 0xbf4   :  { %1868 = vmatprep.subr.bf16.mxu1 %v1960_v13 }
 0xcc1   :  { %v760_v54 = vpop.f32.mrb[4].mxu1 }
 0xcc2   :  { %v764_v55 = vadd.f32 %v760_v54, %v2140_v32  ;;  %v1728_v56 = vpop.f32.mrb[5].mxu1 }
 0xcc4   :  { %1923 = vtanh.f32 %v764_v55  ;;  %v1558_v58 = vmul.f32 -1.442695, %v764_v55 }
 0xcc6   :  { %1925 = vpow2.f32 %v1558_v58  ;;  %v1965_v58 = vmov 0  }
 0xcc7   :  { %1890 = vset.pattern.permute.xlu0 %v1965_v58 }
 0xcce   :  { %v1924_v57 = vpop.eup %1923 }
 0xccf   :  { %777 = vrot.lane.b32.xlu0 %v1924_v57, %s1963_s19 }
 0xcd0   :  { %v1926_v59 = vpop.eup %1925 }
 0xcd1   :  { %v768_v60 = vadd.f32 1.0, %v1926_v59 }
 0xcd3   :  { %1927 = vrcp.f32 %v768_v60  ;;  %v1121_v60 = vld [vmem:[%s2323_s6] sm:$0x3] }
 0xcdd   :  { %v1928_v61 = vpop.eup %1927 }
 0xcde   :  { %v775_v1 = vmul.f32 %v1928_v61, %v773_v0 }
 0xd41   :  { %v778_v62 = vpop.permute.xlu0 %777 }
 0xd42   :  { %v780_v63 = vmul.f32 %v1928_v61, %v778_v62 }
 0xd44   :  { %782 = vrot.lane.b32.xlu1 %v780_v63, %s1964_s5 }
 0xdb6   :  { %v783_v2 = vpop.permute.xlu1 %782 }
 0xdb7   :  { %v785_v3 = vadd.f32 %v783_v2, %v775_v1 }
 0xdb9   :  { %1929 = vtanh.f32 %v785_v3 }
 0xdc3   :  { %v1930_v4 = vpop.eup %1929 }
 0xdc4   :  { %788 = vrot.lane.b32.xlu0 %v1930_v4, %s1963_s19 }
 0xe36   :  { %v789_v5 = vpop.permute.xlu0 %788 }
 0xe37   :  { %v791_v6 = vmul.f32 %v1928_v61, %v789_v5 }
 0xe39   :  { %v792_v7 = vadd.f32 %v791_v6, %v689_v52  ;;  %794 = vrot.lane.b32.xlu1 %v791_v6, %s1964_s5  ;;  %v1129_v6 = vld [vmem:[%s2324_s7] sm:$0x3] }
 0xeab   :  { %v795_v8 = vpop.permute.xlu1 %794 }
 0xeac   :  { %1738 = vmatmul.mubr.msk.f32.vlgmr.msra.gmra.mrb[8].mxu0 %vm262_vm7, %v795_v8  ;;  %v1140_v8 = vld [vmem:[%s2325_s8 + $0x8] sm:$0xff] }
 0xead   :  { %1864 = vmatpush3.bf16.msra.mxu0 %v2101_v17  ;;  %1759 = vmatprep.mubr.msk.f32.mxu0 %vm1961_vm5, %v1962_v22 }
 0xeae   :  { %1865 = vmatprep.subr.bf16.mxu0 %v1960_v13 }
 0xeb1   :  { %1867 = vmatpush3.bf16.msra.mxu0 %v2114_v21  ;;  %v880_v21 = vrot.slane %v785_v3, 6 }
 0xeb2   :  { %1874 = vmatprep.subr.bf16.mxu0 %v1960_v13 }
 0xf7f   :  { %v864_v9 = vpop.f32.mrb[8].mxu0 }
 0xf80   :  { %v869_v10 = vrot.slane %v864_v9, 6  ;;  %v1739_v11 = vpop.f32.mrb[9].mxu0  ;;  %v1141_v9 = vld [vmem:[%s2325_s8 + $0x10] sm:$0xff] }
 0xf81   :  { %v1142_v11 = vld [vmem:[%s2325_s8 + $0x18] sm:$0xff] }
 0xf82   :  { %v871_v12 = vadd.f32 %v869_v10, %v2140_v32 }
 0xf84   :  { %1931 = vtanh.f32 %v871_v12  ;;  %v1560_v15 = vmul.f32 -1.442695, %v871_v12 }
 0xf86   :  { %1933 = vpow2.f32 %v1560_v15 }
 0xf8e   :  { %v1932_v14 = vpop.eup %1931 }
 0xf8f   :  { %884 = vrot.lane.b32.xlu0 %v1932_v14, %s1963_s19  ;;  %v1872_v14 = vpack.c.bf16 %v1142_v11, %v1141_v9  ;;  %v23_v11 = vstv %s2333_s17 }
 0xf90   :  { %v1934_v17 = vpop.eup %1933  ;;  %24 = vst [vmem:[#allocation2] sm:$0x1] %v23_v11 }
 0xf91   :  { %v875_v16 = vadd.f32 1.0, %v1934_v17  ;;  %v1143_v17 = vld [vmem:[%s2325_s8 + $0x20] sm:$0x1] }
 0xf93   :  { %1935 = vrcp.f32 %v875_v16 }
 0xf9d   :  { %v1936_v18 = vpop.eup %1935 }
 0xf9e   :  { %v882_v23 = vmul.f32 %v1936_v18, %v880_v21 }
0x1001   :  { %v885_v19 = vpop.permute.xlu0 %884 }
0x1002   :  { %v887_v20 = vmul.f32 %v1936_v18, %v885_v19 }
0x1004   :  { %889 = vrot.lane.b32.xlu1 %v887_v20, %s1964_s5 }
0x1076   :  { %v890_v24 = vpop.permute.xlu1 %889 }
0x1077   :  { %v892_v25 = vadd.f32 %v890_v24, %v882_v23 }
0x1079   :  { %1937 = vtanh.f32 %v892_v25  ;;  %v989_v45 = vrot.slane %v892_v25, 6 }
0x1083   :  { %v1938_v26 = vpop.eup %1937 }
0x1084   :  { %895 = vrot.lane.b32.xlu0 %v1938_v26, %s1963_s19 }
0x10f6   :  { %v896_v27 = vpop.permute.xlu0 %895 }
0x10f7   :  { %v898_v28 = vmul.f32 %v1936_v18, %v896_v27  ;;  %v1271_v27 = vld [vmem:[%s2326_s12] sm:$0xff] }
0x10f9   :  { %v900_v29 = vrot.slane %v898_v28, 2  ;;  %v1272_v28 = vld [vmem:[%s2326_s12 + $0x8] sm:$0xff] }
0x10fb   :  { %v902_v30 = vadd.f32 %v900_v29, %v792_v7  ;;  %903 = vrot.lane.b32.xlu1 %v900_v29, %s1964_s5  ;;  %v1139_v7 = vld [vmem:[%s2325_s8] sm:$0xff]  ;;  %v1875_v29 = vpack.c.bf16 %v1272_v28, %v1271_v27 }
0x10fc   :  { %v1869_v10 = vpack.c.bf16 %v1140_v8, %v1139_v7  ;;  %v1450_v7 = vld [vmem:[%s2332_s16] sm:$0xff]  ;;  %v1451_v8 = vld [vmem:[%s2332_s16 + $0x8] sm:$0xff] }
0x10fd   :  { %v1881_v9 = vpack.c.bf16 %v1451_v8, %v1450_v7 }
0x116d   :  { %v904_v31 = vpop.permute.xlu1 %903 }
0x116e   :  { %1749 = vmatmul.mubr.msk.f32.vlgmr.msra.gmra.mrb[6].mxu1 %vm262_vm7, %v904_v31  ;;  %v1565_v31 = vld [vmem:[%s2327_s9] ss:$0 sm:$0xff] }
0x116f   :  { %1772 = vmatprep.mubr.msk.f32.mxu1 %vm1961_vm5, %v1962_v22  ;;  %1870 = vmatpush3.bf16.msra.mxu1 %v1869_v10  ;;  %v1452_v10 = vld [vmem:[%s2332_s16 + $0x10] sm:$0xf] }
0x1170   :  { %1871 = vmatprep.subr.bf16.mxu1 %v1960_v13 }
0x1173   :  { %1873 = vmatpush3.bf16.msra.mxu1 %v1872_v14 }
0x1174   :  { %1770 = vmatprep.subr.mxu1 %v1962_v22 }
0x1177   :  { %1771 = vmatpush3.msk.msra.mxu1 %vm1155_vm8, %v1143_v17 }
0x1178   :  { %1877 = vmatprep.subr.bf16.mxu1 %v1960_v13 }
0x1241   :  { %v973_v33 = vpop.f32.mrb[6].mxu1 }
0x1242   :  { %v978_v35 = vrot.slane %v973_v33, 4  ;;  %v1750_v36 = vpop.f32.mrb[7].mxu1 }
0x1244   :  { %v980_v37 = vadd.f32 %v978_v35, %v2140_v32 }
0x1246   :  { %1939 = vtanh.f32 %v980_v37  ;;  %v1562_v39 = vmul.f32 -1.442695, %v980_v37 }
0x1248   :  { %1941 = vpow2.f32 %v1562_v39 }
0x1250   :  { %v1940_v38 = vpop.eup %1939 }
0x1251   :  { %993 = vrot.lane.b32.xlu0 %v1940_v38, %s1963_s19 }
0x1252   :  { %v1942_v40 = vpop.eup %1941 }
0x1253   :  { %v984_v41 = vadd.f32 1.0, %v1942_v40 }
0x1255   :  { %1943 = vrcp.f32 %v984_v41 }
0x125f   :  { %v1944_v42 = vpop.eup %1943 }
0x1260   :  { %v991_v46 = vmul.f32 %v1944_v42, %v989_v45 }
0x12c3   :  { %v994_v43 = vpop.permute.xlu0 %993 }
0x12c4   :  { %v996_v44 = vmul.f32 %v1944_v42, %v994_v43 }
0x12c6   :  { %998 = vrot.lane.b32.xlu1 %v996_v44, %s1964_s5 }
0x1338   :  { %v999_v47 = vpop.permute.xlu1 %998 }
0x1339   :  { %v1001_v48 = vadd.f32 %v999_v47, %v991_v46 }
0x133b   :  { %1945 = vtanh.f32 %v1001_v48 }
0x1345   :  { %v1946_v34 = vpop.eup %1945 }
0x1346   :  { %1004 = vrot.lane.b32.xlu0 %v1946_v34, %s1963_s19 }
0x13b8   :  { %v1005_v49 = vpop.permute.xlu0 %1004 }
0x13b9   :  { %v1007_v50 = vmul.f32 %v1944_v42, %v1005_v49 }
0x13bb   :  { %v1009_v51 = vrot.slane %v1007_v50, 4 }
0x13bd   :  { %v1011_v52 = vadd.f32 %v1009_v51, %v902_v30  ;;  %1012 = vrot.lane.b32.xlu1 %v1009_v51, %s1964_s5  ;;  %v1273_v30 = vld [vmem:[%s2326_s12 + $0x10] sm:$0xf] }
0x142f   :  { %v1013_v53 = vpop.permute.xlu1 %1012 }
0x1430   :  { %1760 = vmatmul.mubr.msk.f32.vlgmr.msra.gmra.mrb[10].mxu0 %vm262_vm7, %v1013_v53 }
0x1431   :  { %1781 = vmatprep.mubr.msk.f32.mxu0 %vm1961_vm5, %v1962_v22  ;;  %1876 = vmatpush3.bf16.msra.mxu0 %v1875_v29 }
0x1432   :  { %1779 = vmatprep.subr.mxu0 %v1962_v22 }
0x1435   :  { %1780 = vmatpush3.msk.msra.mxu0 %vm79_vm0, %v1273_v30 }
0x1436   :  { %1880 = vmatprep.subr.bf16.mxu0 %v1960_v13 }
0x1503   :  { %v1082_v54 = vpop.f32.mrb[10].mxu0 }
0x1504   :  { %v1087_v55 = vrot.slane %v1082_v54, 2  ;;  %v1761_v56 = vpop.f32.mrb[11].mxu0  ;;  %v1568_v54 = vld [vmem:[%s2328_s10] ss:$0 sm:$0xff] }
0x1506   :  { %v1089_v57 = vadd.f32 %v1087_v55, %v2140_v32  ;;  %v1098_v32 = vrot.slane %v1001_v48, 6 }
0x1508   :  { %1947 = vtanh.f32 %v1089_v57  ;;  %v1564_v61 = vmul.f32 -1.442695, %v1089_v57  ;;  %v1569_v57 = vld [vmem:[%s2329_s11] ss:$0 sm:$0xff] }
0x150a   :  { %1949 = vpow2.f32 %v1564_v61 }
0x1512   :  { %v1948_v59 = vpop.eup %1947 }
0x1513   :  { %1102 = vrot.lane.b32.xlu0 %v1948_v59, %s1963_s19 }
0x1514   :  { %v1950_v62 = vpop.eup %1949 }
0x1515   :  { %v1093_v63 = vadd.f32 1.0, %v1950_v62  ;;  %v1361_v62 = vld [vmem:[%s2330_s14] sm:$0xff] }
0x1517   :  { %1124 = vperm.xlu0 %1890, %v1121_v60   ;;  %1951 = vrcp.f32 %v1093_v63  ;;  %v1362_v63 = vld [vmem:[%s2330_s14 + $0x8] sm:$0xff] }
0x151b   :  { %1135 = vrot.lane.b32.xlu0 %v1129_v6, %s1964_s5 }
0x1521   :  { %v1952_v0 = vpop.eup %1951 }
0x1522   :  { %v1100_v3 = vmul.f32 %v1952_v0, %v1098_v32 }
0x1585   :  { %v1103_v1 = vpop.permute.xlu0 %1102 }
0x1586   :  { %v1105_v2 = vmul.f32 %v1952_v0, %v1103_v1  ;;  %v1363_v1 = vld [vmem:[%s2330_s14 + $0x10] sm:$0xf] }
0x1588   :  { %1107 = vrot.lane.b32.xlu1 %v1105_v2, %s1964_s5  ;;  %v1570_v2 = vld [vmem:[%s2331_s13] ss:$0 sm:$0xff] }
0x1596   :  { %v1125_v15 = vpop.permute.xlu0 %1124 }
0x159a   :  { %v1136_v24 = vpop.permute.xlu0 %1135 }
0x15fa   :  { %v1108_v4 = vpop.permute.xlu1 %1107 }
0x15fb   :  { %v1110_v5 = vadd.f32 %v1108_v4, %v1100_v3 }
0x15fd   :  { %1953 = vtanh.f32 %v1110_v5 }
0x15fe   :  { %1955 = vrcp.f32 %v1125_v15 }
0x1607   :  { %v1954_v12 = vpop.eup %1953 }
0x1608   :  { %1113 = vrot.lane.b32.xlu1 %v1954_v12, %s1963_s19  ;;  %v1956_v20 = vpop.eup %1955  ;;  %v1573_v12 = vld [vmem:[%s2334_s15] ss:$0 sm:$0xff] }
0x167a   :  { %v1114_v16 = vpop.permute.xlu1 %1113 }
0x167b   :  { %v1116_v18 = vmul.f32 %v1952_v0, %v1114_v16  ;;  %v1878_v0 = vpack.c.bf16 %v1362_v63, %v1361_v62 }
0x167d   :  { %v1118_v19 = vrot.slane %v1116_v18, 6  ;;  %v1576_v18 = vld [vmem:[#allocation2] ss:$0 sm:$0xff] }
0x167f   :  { %v1120_v21 = vadd.f32 %v1118_v19, %v1011_v52 }
0x1681   :  { %v1128_v23 = vmul.f32 %v1956_v20, %v1120_v21 }
0x1683   :  { %1131 = vrot.lane.b32.xlu1 %v1128_v23, %s1964_s5 }
0x16f5   :  { %v1132_v25 = vpop.permute.xlu1 %1131 }
0x16f6   :  { %v1138_v26 = vsel %vm262_vm7, %v1132_v25, %v1136_v24 }
0x16f7   :  { %1773 = vmatmul.mubr.msk.f32.vlgmr.msra.gmra.mrb[8].mxu1 %vm1151_vm9, %v1138_v26 }
0x16f8   :  { %1790 = vmatprep.mubr.msk.f32.mxu1 %vm1961_vm5, %v1962_v22  ;;  %1879 = vmatpush3.bf16.msra.mxu1 %v1878_v0 }
0x16f9   :  { %1788 = vmatprep.subr.mxu1 %v1962_v22 }
0x16fc   :  { %1789 = vmatpush3.msk.msra.mxu1 %vm79_vm0, %v1363_v1 }
0x17ca   :  { %v1225_v33 = vpop.f32.mrb[8].mxu1 }
0x17cb   :  { %v1226_v35 = vadd.f32 %v1565_v31, %v1225_v33  ;;  %v1774_v36 = vpop.f32.mrb[9].mxu1 }
0x17cd   :  { %v1230_v37 = vsel %vm1229_vm10, %v1226_v35, 0.0 }
0x17ce   :  { %v1231_v38 = vrot.slane %v1230_v37, 4 }
0x17d0   :  { %v1232_v39 = vadd.f32 %v1231_v38, %v1230_v37 }
0x17d2   :  { %v1233_v40 = vrot.slane %v1232_v39, 2 }
0x17d4   :  { %v1234_v41 = vadd.f32 %v1233_v40, %v1232_v39 }
0x17d6   :  { %v1235_v42 = vrot.slane %v1234_v41, 1 }
0x17d8   :  { %v1236_v43 = vadd.f32 %v1235_v42, %v1234_v41 }
0x17da   :  { %v1238_v44 = vmul.f32 0.5, %v1236_v43 }
0x17dc   :  { %v1239_v45 = vsub.f32 %v1226_v35, %v1238_v44 }
0x17de   :  { %v1240_v46 = vmul.f32 %v1239_v45, %v1239_v45  ;;  %v1256_v55 = vmul.f32 %v1568_v54, %v1239_v45 }
0x17e0   :  { %v1241_v47 = vsel %vm1229_vm10, %v1240_v46, 0.0 }
0x17e1   :  { %v1242_v13 = vrot.slane %v1241_v47, 4 }
0x17e3   :  { %v1243_v48 = vadd.f32 %v1242_v13, %v1241_v47 }
0x17e5   :  { %v1244_v34 = vrot.slane %v1243_v48, 2 }
0x17e7   :  { %v1245_v49 = vadd.f32 %v1244_v34, %v1243_v48 }
0x17e9   :  { %v1246_v50 = vrot.slane %v1245_v49, 1 }
0x17eb   :  { %v1247_v51 = vadd.f32 %v1246_v50, %v1245_v49 }
0x17ed   :  { %v1248_v52 = vmul.f32 0.5, %v1247_v51 }
0x17ef   :  { %v1257_v53 = vadd.f32 1e-05, %v1248_v52 }
0x17f1   :  { %1957 = vrsqrt.f32 %v1257_v53 }
0x17fb   :  { %v1958_v56 = vpop.eup %1957 }
0x17fc   :  { %v1259_v58 = vmul.f32 %v1958_v56, %v1256_v55 }
0x17fe   :  { %v1267_v59 = vadd.f32 %v1569_v57, %v1259_v58 }
0x1800   :  { %vm1268_vm11 = vcmp.gt.f32.partialorder %v1267_v59, 0.0  ;;  %v1269_v60 = vmul.f32 0.01, %v1267_v59 }
0x1802   :  { %v1270_v61 = vsel %vm1268_vm11, %v1267_v59, %v1269_v60 }
0x1803   :  { %1782 = vmatmul.mubr.msk.f32.vlgmr.msra.gmra.mrb[12].mxu0 %vm1281_vm12, %v1270_v61 }
0x1804   :  { %1799 = vmatprep.mubr.msk.f32.mxu0 %vm1961_vm5, %v1962_v22  ;;  %1882 = vmatpush3.bf16.msra.mxu0 %v1881_v9 }
0x1805   :  { %1797 = vmatprep.subr.mxu0 %v1962_v22 }
0x1808   :  { %1798 = vmatpush3.msk.msra.mxu0 %vm79_vm0, %v1452_v10 }
0x18d6   :  { %v1354_v32 = vpop.f32.mrb[12].mxu0 }
0x18d7   :  { %v1355_v3 = vadd.f32 %v1570_v2, %v1354_v32  ;;  %v1783_v4 = vpop.f32.mrb[13].mxu0 }
0x18d9   :  { %vm1358_vm13 = vcmp.gt.f32.partialorder %v1355_v3, 0.0  ;;  %v1359_v5 = vmul.f32 0.01, %v1355_v3 }
0x18db   :  { %v1360_v6 = vsel %vm1358_vm13, %v1355_v3, %v1359_v5 }
0x18dc   :  { %1791 = vmatmul.mubr.msk.f32.vlgmr.msra.gmra.mrb[10].mxu1 %vm1281_vm12, %v1360_v6 }
0x19af   :  { %v1443_v14 = vpop.f32.mrb[10].mxu1 }
0x19b0   :  { %v1444_v15 = vadd.f32 %v1573_v12, %v1443_v14  ;;  %v1792_v17 = vpop.f32.mrb[11].mxu1 }
0x19b2   :  { %vm1447_vm14 = vcmp.gt.f32.partialorder %v1444_v15, 0.0  ;;  %v1448_v22 = vmul.f32 0.01, %v1444_v15 }
0x19b4   :  { %v1449_v16 = vsel %vm1447_vm14, %v1444_v15, %v1448_v22 }
0x19b5   :  { %1800 = vmatmul.mubr.msk.f32.vlgmr.msra.gmra.mrb[14].mxu0 %vm1281_vm12, %v1449_v16 }
0x1a88   :  { %v1532_v19 = vpop.f32.mrb[14].mxu0 }
0x1a89   :  { %v1533_v20 = vadd.f32 %v1576_v18, %v1532_v19  ;;  %v1801_v21 = vpop.f32.mrb[15].mxu0 }
0x1a8b   :  { %1537 = vst.msk [vmem:[%s2335_s18] sm:$0x3] %vm1536_vm15, %v1533_v20 }

</bundles_post_ra>
